<compile_context>
chip_gen: v5e
topology: v5e:2x2
jax: 0.10.0
libtpu: 0.0.40
codegen_flags: <defaults>
</compile_context>

<pallas_src>
import jax
import jax.numpy as jnp
from jax import lax
from jax.experimental import pallas as pl
from jax.experimental.pallas import tpu as pltpu

LANES = 128
VOL_OFF, VOL_END = 0, 3      # volume-head (3) lanes in the fused slab
ROT_OFF, ROT_END = 3, 9      # rot-head 6d lanes
HPH_OFF = 9                  # hand head: folded encoder-latent contribution + bias
HPO_OFF = 10                 # obj head:  folded encoder-latent contribution + bias


# --------------------------- Pallas kernels ---------------------------------

def _make_image_kernel(vol_norm):
    """mean-pool(H*W) -> single (FB,8)@(8,128) matmul -> slab + volume-MSE.

    x_ref   : (FB, HW, 8)  image pixels, channels padded 3->8 (lane-dense K)
    hmt_ref : (FB, 128)    lanes 0..2 = hand_center - obj_center_target
    w_ref   : (8, 128)     folded [vol | rot6 | head_pre_h | head_pre_o | 0]
    slab_ref: (FB, 128)    lane-dense slab output
    vl_ref  : (1, 128)     lane 0 = volume MSE (unweighted)
    TODO(synk): replace with a row-tiled bf16 backbone kernel once the real
                ResNet/UNet/feat_transformer are defined in the reference.
    """
    def kern(x_ref, hmt_ref, w_ref, b_ref, slab_ref, vl_ref):
        xm = jnp.mean(x_ref[...], axis=1)                              # (FB, 8)
        slab = (jnp.dot(xm, w_ref[...], preferred_element_type=jnp.float32)
                + b_ref[...])                                          # (FB, 128)
        slab_ref[...] = slab
        # volume MSE: dvol = vol + (hand_center - target) on lanes 0..2
        lane = lax.broadcasted_iota(jnp.int32, slab.shape, 1)
        d = jnp.where(lane < 3, slab + hmt_ref[...], 0.0)
        v = jnp.sum(d * d) * vol_norm
        vl_ref[...] = jnp.where(
            lax.broadcasted_iota(jnp.int32, (1, LANES), 1) == 0, v, 0.0)
    return kern


def _make_points_kernel(clamp):
    """Both SDF heads + clamp + masked-L1 partial sums for one (fb, point-tile).

    pts_ref : (8, TN)   packed point columns [x, y, z, 1, gt_h, gt_o, m_h, m_o]
    w_ref   : (8, 8)    per-fb head weights; row0 = hand, row1 = obj:
                        [w_xyz(3), head_pre(+bias), 0,0,0,0]
    pred_ref: (2, TN)   lane-dense clamped predictions (row0 hand, row1 obj)
    loss_ref: (8, 128)  per-tile partials, row0 lanes [s_h, sm_h, s_o, sm_o]
    """
    def kern(pts_ref, w_ref, pred_ref, loss_ref):
        pts = pts_ref[...]                                             # (8, TN)
        raw = jnp.dot(w_ref[...], pts,
                      preferred_element_type=jnp.float32)              # (8, TN)
        pred = jnp.clip(raw, -clamp, clamp)
        pred_ref[...] = pred[0:2, :]                                   # lane-dense store

        gt = jnp.clip(pts[4:6, :], -clamp, clamp)                      # gt clamp (ref)
        m = pts[6:8, :]
        d = jnp.abs(pred[0:2, :] * m - gt * m)
        s_h = jnp.sum(d[0:1, :])
        s_o = jnp.sum(d[1:2, :])
        sm_h = jnp.sum(m[0:1, :])
        sm_o = jnp.sum(m[1:2, :])

        lane = lax.broadcasted_iota(jnp.int32, (8, LANES), 1)
        row = lax.broadcasted_iota(jnp.int32, (8, LANES), 0)
        vals = (jnp.where(lane == 0, s_h, 0.0)
                + jnp.where(lane == 1, sm_h, 0.0)
                + jnp.where(lane == 2, s_o, 0.0)
                + jnp.where(lane == 3, sm_o, 0.0))
        loss_ref[...] = jnp.where(row == 0, vals, 0.0)
    return kern


# ------------------------------ wrappers -------------------------------------

def image_pipeline(x_img, hmt, w_img, b_img, vol_norm):
    FB = x_img.shape[0]
    return pl.pallas_call(
        _make_image_kernel(vol_norm),
        out_shape=(jax.ShapeDtypeStruct((FB, LANES), jnp.float32),
                   jax.ShapeDtypeStruct((1, LANES), jnp.float32)),
        compiler_params=pltpu.CompilerParams(vmem_limit_bytes=32 * 1024 * 1024),
    )(x_img, hmt, w_img, b_img)


def points_heads_and_losses(pts_T, w_pt_all, FB, T, TN, clamp):
    FN = pts_T.shape[1]
    return pl.pallas_call(
        _make_points_kernel(clamp),
        out_shape=(jax.ShapeDtypeStruct((2, FN), jnp.float32),
                   jax.ShapeDtypeStruct((FB * T * 8, LANES), jnp.float32)),
        grid=(FB, T),
        in_specs=[pl.BlockSpec((8, TN), lambda fb, t: (0, fb * T + t)),
                  pl.BlockSpec((8, 8), lambda fb, t: (fb, 0))],
        out_specs=(pl.BlockSpec((2, TN), lambda fb, t: (0, fb * T + t)),
                   pl.BlockSpec((8, LANES), lambda fb, t: (fb * T + t, 0))),
        compiler_params=pltpu.CompilerParams(
            dimension_semantics=("parallel", "parallel"),   # both TCs on v7x
            vmem_limit_bytes=32 * 1024 * 1024),
    )(pts_T, w_pt_all)


# ----------------------------- JAX glue --------------------------------------

def ortho6d_to_rotmat(x6):
    """compute_rotation_matrix_from_ortho6d (Zhou et al.) — tiny per-(f,b) glue."""
    a1, a2 = x6[:, 0:3], x6[:, 3:6]
    b1 = a1 / (jnp.linalg.norm(a1, axis=-1, keepdims=True) + 1e-8)
    b2 = a2 - jnp.sum(b1 * a2, axis=-1, keepdims=True) * b1
    b2 = b2 / (jnp.linalg.norm(b2, axis=-1, keepdims=True) + 1e-8)
    b3 = jnp.cross(b1, b2)
    return jnp.stack([b1, b2, b3], axis=-1)   # (FB, 3, 3)


def init_params(key, cfg):
    ks = jax.random.split(key, 14)
    s = 0.1

    def lin(kw, kb, fan_in, fan_out):
        return (s * jax.random.normal(kw, (fan_in, fan_out), jnp.float32),
                s * jax.random.normal(kb, (1, fan_out), jnp.float32))

    p = {}
    p['w_bb'], p['b_bb'] = lin(ks[0], ks[1], 3, cfg['c_bb'])                      # backbone stub
    p['w_unet'], p['b_unet'] = lin(ks[2], ks[3], cfg['c_bb'], cfg['c_feat'])      # backbone_2_sdf stub
    p['w_enc'], p['b_enc'] = lin(ks[4], ks[5], cfg['c_feat'], cfg['sdf_latent'])  # sdf_encoder
    p['w_hand'], p['b_hand'] = lin(ks[6], ks[7], cfg['sdf_latent'] + cfg['hand_point_latent'], 1)
    p['w_obj'], p['b_obj'] = lin(ks[8], ks[9], cfg['sdf_latent'] + cfg['obj_point_latent'], 1)
    p['w_rot'], p['b_rot'] = lin(ks[10], ks[11], cfg['c_bb'], 6)                  # rot_head stub
    p['w_vol'], p['b_vol'] = lin(ks[12], ks[13], cfg['c_bb'], 3)                  # volume_head stub
    return p


def prepare_fused_params(params, cfg):
    """Fold every linear-stub chain host-side (exact: all stages are linear).

    w_img/b_img: pooled mean (3 ch, padded to 8) -> [vol | rot6 | hp_hand | hp_obj].
    hp_* already contain (UNet∘encoder∘head-latent) and the head bias.
    """
    L = cfg['sdf_latent']
    assert cfg['hand_point_latent'] == 3 and cfg['obj_point_latent'] == 3
    w_bb, b_bb = params['w_bb'], params['b_bb']                     # (3,c_bb),(1,c_bb)
    w_ue = params['w_unet'] @ params['w_enc']                       # (c_bb, L)
    b_ue = params['b_unet'] @ params['w_enc'] + params['b_enc']     # (1, L)
    wh_lat = params['w_hand'][:L, 0]                                # (L,)
    wo_lat = params['w_obj'][:L, 0]

    w_img = jnp.zeros((8, LANES), jnp.float32)
    b_img = jnp.zeros((1, LANES), jnp.float32)
    w_img = w_img.at[0:3, VOL_OFF:VOL_END].set(w_bb @ params['w_vol'])
    w_img = w_img.at[0:3, ROT_OFF:ROT_END].set(w_bb @ params['w_rot'])
    w_img = w_img.at[0:3, HPH_OFF].set(w_bb @ (w_ue @ wh_lat))
    w_img = w_img.at[0:3, HPO_OFF].set(w_bb @ (w_ue @ wo_lat))
    b_img = b_img.at[:, VOL_OFF:VOL_END].set(b_bb @ params['w_vol'] + params['b_vol'])
    b_img = b_img.at[:, ROT_OFF:ROT_END].set(b_bb @ params['w_rot'] + params['b_rot'])
    enc_bias = b_bb @ w_ue + b_ue                                   # (1, L)
    b_img = b_img.at[0, HPH_OFF].set((enc_bias @ wh_lat)[0] + params['b_hand'][0, 0])
    b_img = b_img.at[0, HPO_OFF].set((enc_bias @ wo_lat)[0] + params['b_obj'][0, 0])

    return dict(w_img=w_img, b_img=b_img,
                w_hand_xyz=params['w_hand'][L:L + 3, 0],
                w_obj_xyz=params['w_obj'][L:L + 3, 0])


def forward_train(params, fused, inputs, targets, metas, cfg):
    imgs = inputs['img']                      # (F, B, 3, H, W)
    F_, B = imgs.shape[0], imgs.shape[1]
    H, W = imgs.shape[3], imgs.shape[4]
    n_hand = targets['hand_sdf'].shape[2]
    n_obj = targets['obj_sdf'].shape[2]
    P = n_hand + n_obj
    assert P == cfg['num_sample_points']
    FB = F_ * B
    clamp = cfg['clamp_dist']

    # Point tiling: pad P per-(f,b) to a multiple of 128 (zero masks -> loss
    # neutral), so every pts/pred block is lane-dense and TN never silently
    # becomes a VMEM-busting giant block.
    P_pad = ((P + 127) // 128) * 128
    TN = 128
    for cand in (2048, 1024, 512, 256):
        if P_pad % cand == 0:
            TN = cand
            break
    T = P_pad // TN
    FN = FB * P_pad

    # ---- packed per-point stream (8, FN): rows [x,y,z,1,gt_h,gt_o,m_h,m_o] ----
    sdf_data = jnp.concatenate([targets['hand_sdf'], targets['obj_sdf']], axis=2)  # (F,B,P,5)
    if metas['epoch'] < cfg['sdf_add_epoch']:
        m_h = jnp.concatenate([jnp.ones((B, n_hand)), jnp.zeros((B, n_obj))], axis=1)
        m_o = jnp.concatenate([jnp.zeros((B, n_hand)), jnp.ones((B, n_obj))], axis=1)
    else:
        m_h = jnp.ones((B, P))
        m_o = jnp.ones((B, P))
    # NOTE: the fused single-accumulator loss below is exact only because mask
    # sums are identical for every frame (true for this construction, as in the
    # reference).  If masks become per-frame data-dependent, switch to per-frame
    # normalization of the per-tile partials.
    pts = jnp.concatenate([
        sdf_data[..., 0:3],
        jnp.ones((F_, B, P, 1), jnp.float32),
        sdf_data[..., 3:4],
        sdf_data[..., 4:5],
        jnp.broadcast_to(m_h[None, :, :, None], (F_, B, P, 1)).astype(jnp.float32),
        jnp.broadcast_to(m_o[None, :, :, None], (F_, B, P, 1)).astype(jnp.float32),
    ], axis=-1)                                                        # (F,B,P,8)
    pts = jnp.pad(pts, ((0, 0), (0, 0), (0, P_pad - P), (0, 0)))
    pts_T = pts.reshape(FN, 8).T                                       # (8, FN)

    # ---- pose_model ----
    # TODO(synk): pose_model internals (backbone/neck/volume_head/soft_argmax/
    # decode_volume/ik_solver_mano) are undefined in the reference; deterministic stub.
    hand_pose_results_frames = []
    for i in range(F_):
        hand_pose_results_frames.append({
            'global_trans': jnp.tile(jnp.eye(4, dtype=jnp.float32)[None, None], (B, 21, 1, 1)),
            'volume_joints': metas['hand_joints_stub'][i],
        })

    # ---- Kernel A: mean-pool + fused [vol|rot6|head_pre] slab + volume MSE ----
    img_flat = jnp.transpose(imgs, (0, 1, 3, 4, 2)).reshape(FB, H * W, 3)
    x_img = jnp.pad(img_flat, ((0, 0), (0, 0), (0, 5)))                # channels 3 -> 8
    hand_center = metas['hand_center_3d'].reshape(FB, 3)
    hmt = jnp.zeros((FB, LANES), jnp.float32).at[:, 0:3].set(
        hand_center - targets['obj_center_3d'].reshape(FB, 3))
    slab, vl = image_pipeline(x_img, hmt, fused['w_img'], fused['b_img'],
                              vol_norm=1.0 / float(FB * 3))

    # ---- obj pose geometry (tiny per-(f,b) glue, cfg.rot_style == '6d') ----
    vol = slab[:, VOL_OFF:VOL_END]
    center = vol + hand_center                                         # volume_joint_preds
    rotmat = ortho6d_to_rotmat(slab[:, ROT_OFF:ROT_END])
    obj_transform = jnp.zeros((FB, 4, 4), jnp.float32)
    obj_transform = obj_transform.at[:, :3, 3].set(center - hand_center)
    obj_transform = obj_transform.at[:, 3, 3].set(1.0)
    obj_transform = obj_transform.at[:, :3, :3].set(rotmat)
    rest = metas['obj_rest_corners_3d'].reshape(FB, 8, 3)
    corners = jnp.einsum('bij,bkj->bki', rotmat, rest) + center[:, None, :]
    joints = metas['hand_joints_stub'].reshape(FB, 21, 3) - hand_center[:, None, :]

    # ---- per-(f,b) SDF-head weights (xyz part shared, latent part folded) ----
    hp = slab[:, HPH_OFF:HPH_OFF + 2]                                  # (FB, 2)
    w_pt = jnp.zeros((FB, 8, 8), jnp.float32)
    w_pt = w_pt.at[:, 0, 0:3].set(jnp.broadcast_to(fused['w_hand_xyz'][None, :], (FB, 3)))
    w_pt = w_pt.at[:, 1, 0:3].set(jnp.broadcast_to(fused['w_obj_xyz'][None, :], (FB, 3)))
    w_pt = w_pt.at[:, 0, 3].set(hp[:, 0])
    w_pt = w_pt.at[:, 1, 3].set(hp[:, 1])
    w_pt_all = w_pt.reshape(FB * 8, 8)

    # ---- Kernel B: SDF heads + clamp + masked-L1 partials ----
    pred_T, loss_part = points_heads_and_losses(pts_T, w_pt_all, FB, T, TN, clamp)

    loss_sums = jnp.sum(loss_part, axis=0)                             # (128,)
    s_h, sm_h, s_o, sm_o = loss_sums[0], loss_sums[1], loss_sums[2], loss_sums[3]
    # sum_f(w*L1_f/msum)/F == w*total_L1/(F*msum) (msum identical per frame).
    loss = {
        'hand_sdf': cfg['hand_sdf_weight'] * s_h / jnp.maximum(sm_h, 1.0),
        'obj_sdf': cfg['obj_sdf_weight'] * s_o / jnp.maximum(sm_o, 1.0),
        'volume_joint': cfg['volume_weight'] * vl[0, 0],
    }

    # ---- per-frame outputs (cheap slicing of the lane-dense batched results) ----
    pred_fb = pred_T.reshape(2, F_, B, P_pad)
    sdf_hand_frames = [pred_fb[0, i, :, :P].reshape(B * P, 1) for i in range(F_)]
    sdf_obj_frames = [pred_fb[1, i, :, :P].reshape(B * P, 1) for i in range(F_)]
    sdf_results = {'hand': sdf_hand_frames, 'obj': sdf_obj_frames, 'cls': None}

    center_f = center.reshape(F_, B, 3)
    trans_f = obj_transform.reshape(F_, B, 4, 4)
    corners_f = corners.reshape(F_, B, 8, 3)
    joints_f = joints.reshape(F_, B, 21, 3)
    obj_pose_results_frames = []
    for i in range(F_):
        obj_pose_results_frames.append({
            'corners': corners_f[i],
            'global_trans': trans_f[i],
            'center': center_f[i][:, None, :],
            'wrist_trans': hand_pose_results_frames[i]['global_trans'][:, 0],
            'joints': joints_f[i],
        })

    return loss, sdf_results, hand_pose_results_frames, obj_pose_results_frames


# --------------------------------- main --------------------------------------

if __name__ == "__main__":
    cfg = dict(
        hand_branch=True, obj_branch=True, with_add_feats=False,
        num_sample_points=128, clamp_dist=0.05, sdf_add_epoch=10,
        hand_sdf_weight=1.0, obj_sdf_weight=1.0, volume_weight=1.0,
        sdf_latent=16, hand_point_latent=3, obj_point_latent=3,
        c_bb=64, c_feat=32,
    )

    key = jax.random.PRNGKey(0)
    kp, k1, k2, k3, k4, k5, k6, k7 = jax.random.split(key, 8)
    params = init_params(kp, cfg)
    fused = prepare_fused_params(params, cfg)

    F_, B, H, W = 2, 2, 16, 16
    n_hand = n_obj = cfg['num_sample_points'] // 2

    inputs = {'img': jax.random.normal(k1, (F_, B, 3, H, W), jnp.float32)}
    targets = {
        'hand_sdf': 0.1 * jax.random.normal(k2, (F_, B, n_hand, 5), jnp.float32),
        'obj_sdf': 0.1 * jax.random.normal(k3, (F_, B, n_obj, 5), jnp.float32),
        'obj_center_3d': 0.1 * jax.random.normal(k4, (F_, B, 3), jnp.float32),
    }
    metas = {
        'epoch': 0,
        'hand_center_3d': 0.1 * jax.random.normal(k5, (F_, B, 3), jnp.float32),
        'cam_intr': jnp.tile(jnp.eye(3, dtype=jnp.float32)[None, None], (F_, B, 1, 1)),
        'obj_rest_corners_3d': 0.1 * jax.random.normal(k6, (F_, B, 8, 3), jnp.float32),
        'hand_joints_stub': 0.1 * jax.random.normal(k7, (F_, B, 21, 3), jnp.float32),
    }

    loss, sdf_results, hand_frames, obj_frames = forward_train(
        params, fused, inputs, targets, metas, cfg)
    jax.block_until_ready(loss)
    jax.block_until_ready(sdf_results['hand'])
    jax.block_until_ready(sdf_results['obj'])
    jax.block_until_ready([o['corners'] for o in obj_frames])
    print("KERNEL_OK")
</pallas_src>

<mosaic_0001>
module attributes {stable_mosaic.version = 11 : i64} {
  func.func @kern(%arg0: memref<4x256x8xf32, #tpu.memory_space<vmem>>, %arg1: memref<4x128xf32, #tpu.memory_space<vmem>>, %arg2: memref<8x128xf32, #tpu.memory_space<vmem>>, %arg3: memref<1x128xf32, #tpu.memory_space<vmem>>, %arg4: memref<4x128xf32, #tpu.memory_space<vmem>>, %arg5: memref<1x128xf32, #tpu.memory_space<vmem>>) attributes {dimension_semantics = [], scalar_prefetch = 0 : i64, scratch_operands = 0 : i64, tpu.core_type = #tpu.core_type<tc>} {
    %c0 = arith.constant 0 : index
    %c0_0 = arith.constant 0 : index
    %c0_1 = arith.constant 0 : index
    %0 = vector.load %arg0[%c0, %c0_0, %c0_1] : memref<4x256x8xf32, #tpu.memory_space<vmem>>, vector<4x256x8xf32>
    %cst = arith.constant dense<0.000000e+00> : vector<4x8xf32>
    %1 = vector.multi_reduction <add>, %0, %cst [1] : vector<4x256x8xf32> to vector<4x8xf32>
    %cst_2 = arith.constant 2.560000e+02 : f32
    %2 = vector.broadcast %cst_2 : f32 to vector<4x8xf32>
    %3 = arith.divf %1, %2 : vector<4x8xf32>
    %c0_3 = arith.constant 0 : index
    %c0_4 = arith.constant 0 : index
    %4 = vector.load %arg2[%c0_3, %c0_4] : memref<8x128xf32, #tpu.memory_space<vmem>>, vector<8x128xf32>
    %cst_5 = arith.constant dense<0.000000e+00> : vector<4x128xf32>
    %5 = tpu.matmul %3, %4, %cst_5 {dimension_numbers = #tpu.dot_dimension_numbers<[1], [0], [0], [1], [0, 0, 1, 1], [], []>} : vector<4x8xf32>, vector<8x128xf32>, vector<4x128xf32> -> vector<4x128xf32>
    %c0_6 = arith.constant 0 : index
    %c0_7 = arith.constant 0 : index
    %6 = vector.load %arg3[%c0_6, %c0_7] : memref<1x128xf32, #tpu.memory_space<vmem>>, vector<1x128xf32>
    %7 = vector.broadcast %6 : vector<1x128xf32> to vector<4x128xf32>
    %8 = arith.addf %5, %7 : vector<4x128xf32>
    %c0_8 = arith.constant 0 : index
    %c0_9 = arith.constant 0 : index
    %9 = vector.load %arg4[%c0_8, %c0_9] : memref<4x128xf32, #tpu.memory_space<vmem>>, vector<4x128xf32>
    tpu.vector_store %arg4[%c0_8, %c0_9], %8 {strides = array<i32>} : memref<4x128xf32, #tpu.memory_space<vmem>>, vector<4x128xf32>,
    %10 = tpu.iota {dimensions = array<i32: 1>} : vector<4x128xi32>
    %c3_i32 = arith.constant 3 : i32
    %11 = vector.broadcast %c3_i32 : i32 to vector<4x128xi32>
    %12 = arith.cmpi slt, %10, %11 : vector<4x128xi32>
    %c0_10 = arith.constant 0 : index
    %c0_11 = arith.constant 0 : index
    %13 = vector.load %arg1[%c0_10, %c0_11] : memref<4x128xf32, #tpu.memory_space<vmem>>, vector<4x128xf32>
    %14 = arith.addf %8, %13 : vector<4x128xf32>
    %cst_12 = arith.constant 0.000000e+00 : f32
    %15 = vector.broadcast %cst_12 : f32 to vector<4x128xf32>
    %16 = arith.select %12, %14, %15 : vector<4x128xi1>, vector<4x128xf32>
    %17 = arith.mulf %16, %16 : vector<4x128xf32>
    %18 = vector.shape_cast %17 : vector<4x128xf32> to vector<1x4x128xf32>
    %cst_13 = arith.constant dense<0.000000e+00> : vector<1xf32>
    %19 = vector.multi_reduction <add>, %18, %cst_13 [1, 2] : vector<1x4x128xf32> to vector<1xf32>
    %20 = vector.shape_cast %19 : vector<1xf32> to vector<1x1x1xf32>
    %21 = vector.extract %20[0, 0, 0] : f32 from vector<1x1x1xf32>
    %cst_14 = arith.constant 0.0833333358 : f32
    %22 = arith.mulf %21, %cst_14 : f32
    %23 = tpu.iota {dimensions = array<i32: 1>} : vector<1x128xi32>
    %c0_i32 = arith.constant 0 : i32
    %24 = vector.broadcast %c0_i32 : i32 to vector<1x128xi32>
    %25 = arith.cmpi eq, %23, %24 : vector<1x128xi32>
    %cst_15 = arith.constant 0.000000e+00 : f32
    %26 = vector.broadcast %22 : f32 to vector<1x128xf32>
    %27 = vector.broadcast %cst_15 : f32 to vector<1x128xf32>
    %28 = arith.select %25, %26, %27 : vector<1x128xi1>, vector<1x128xf32>
    %c0_16 = arith.constant 0 : index
    %c0_17 = arith.constant 0 : index
    %29 = vector.load %arg5[%c0_16, %c0_17] : memref<1x128xf32, #tpu.memory_space<vmem>>, vector<1x128xf32>
    tpu.vector_store %arg5[%c0_16, %c0_17], %28 {strides = array<i32>} : memref<1x128xf32, #tpu.memory_space<vmem>>, vector<1x128xf32>,
    return
  }
}

</mosaic_0001>

<bundles_post_ra>
// kernel: tpu_custom_call.1
= control target key start
LH: loop header
LB: loop body
LE: loop exit
PB: predicated region body
PF: predicated region fallthrough
CT: control target
= control target key end

     0   :  { %11 = vsyncpa [#allocation3], 0  ;;  %vm149_vm0 = vcmask 64512   ;;  %s1152_s0 = inlined_call_operand.vmem [shape: f32[4,256,8], index: 0, kind: input, shape index: {}]   ;;  %s1153_s1 = inlined_call_operand.vmem [shape: f32[4,128], index: 1, kind: input, shape index: {}]   ;;  %s1154_s2 = inlined_call_operand.vmem [shape: f32[8,128], index: 2, kind: input, shape index: {}]   ;;  %s1155_s3 = inlined_call_operand.vmem [shape: f32[1,128], index: 3, kind: input, shape index: {}]   ;;  %s1156_s4 = inlined_call_operand.hbm [shape: f32[4,128], index: 4, kind: output, shape index: {0}]   ;;  %s1157_s5 = inlined_call_operand.hbm [shape: f32[1,128], index: 5, kind: output, shape index: {1}]  }
   0x1   :  { %v437_v0 = vld [vmem:[%s1154_s2] sm:$0xff]  ;;  %v22_v2 = vld [vmem:[%s1152_s0 + $0x8] sm:$0xff]  ;;  %v23_v3 = vld [vmem:[%s1152_s0 + $0x10] sm:$0xff] }
   0x2   :  { %v21_v1 = vld [vmem:[%s1152_s0] sm:$0xff]  ;;  %469 = vmatpush.msra.mxu0 %v437_v0  ;;  %v24_v4 = vld [vmem:[%s1152_s0 + $0x18] sm:$0xff]  ;;  %v151_v6 = vsel %vm149_vm0, %v22_v2, 0.0  ;;  %v153_v9 = vsel %vm149_vm0, %v23_v3, 0.0  ;;  %v26_v11 = vld [vmem:[%s1152_s0 + $0x28] sm:$0xff] }
   0x3   :  { %v150_v5 = vsel %vm149_vm0, %v21_v1, 0.0  ;;  %v25_v7 = vld [vmem:[%s1152_s0 + $0x20] sm:$0xff]  ;;  %v155_v10 = vsel %vm149_vm0, %v24_v4, 0.0  ;;  %v27_v14 = vld [vmem:[%s1152_s0 + $0x30] sm:$0xff]  ;;  %v159_v16 = vsel %vm149_vm0, %v26_v11, 0.0  ;;  %v28_v17 = vld [vmem:[%s1152_s0 + $0x38] sm:$0xff] }
   0x4   :  { %v152_v8 = vadd.f32 %v151_v6, %v150_v5  ;;  %v157_v13 = vsel %vm149_vm0, %v25_v7, 0.0  ;;  %v161_v19 = vsel %vm149_vm0, %v27_v14, 0.0  ;;  %v29_v20 = vld [vmem:[%s1152_s0 + $0x40] sm:$0xff]  ;;  %v163_v22 = vsel %vm149_vm0, %v28_v17, 0.0  ;;  %v30_v23 = vld [vmem:[%s1152_s0 + $0x48] sm:$0xff]  ;;  %v31_v28 = vld [vmem:[%s1152_s0 + $0x50] sm:$0xff] }
   0x5   :  { %v53_v25 = vld [vmem:[%s1152_s0 + $0x100] sm:$0xff]  ;;  %v54_v26 = vld [vmem:[%s1152_s0 + $0x108] sm:$0xff]  ;;  %v165_v27 = vsel %vm149_vm0, %v29_v20, 0.0  ;;  %v55_v29 = vld [vmem:[%s1152_s0 + $0x110] sm:$0xff]  ;;  %v167_v32 = vsel %vm149_vm0, %v30_v23, 0.0  ;;  %v169_v38 = vsel %vm149_vm0, %v31_v28, 0.0 }
   0x6   :  { %v154_v12 = vadd.f32 %v153_v9, %v152_v8  ;;  %v56_v31 = vld [vmem:[%s1152_s0 + $0x118] sm:$0xff]  ;;  %v219_v35 = vsel %vm149_vm0, %v53_v25, 0.0  ;;  %v220_v36 = vsel %vm149_vm0, %v54_v26, 0.0  ;;  %v57_v37 = vld [vmem:[%s1152_s0 + $0x120] sm:$0xff]  ;;  %v222_v40 = vsel %vm149_vm0, %v55_v29, 0.0  ;;  %v58_v44 = vld [vmem:[%s1152_s0 + $0x128] sm:$0xff] }
   0x7   :  { %v32_v33 = vld [vmem:[%s1152_s0 + $0x58] sm:$0xff]  ;;  %v221_v39 = vadd.f32 %v220_v36, %v219_v35  ;;  %v33_v41 = vld [vmem:[%s1152_s0 + $0x60] sm:$0xff]  ;;  %v224_v43 = vsel %vm149_vm0, %v56_v31, 0.0  ;;  %v34_v47 = vld [vmem:[%s1152_s0 + $0x68] sm:$0xff]  ;;  %v226_v49 = vsel %vm149_vm0, %v57_v37, 0.0  ;;  %v228_v59 = vsel %vm149_vm0, %v58_v44, 0.0 }
   0x8   :  { %v156_v15 = vadd.f32 %v155_v10, %v154_v12  ;;  %v171_v45 = vsel %vm149_vm0, %v32_v33, 0.0  ;;  %v35_v50 = vld [vmem:[%s1152_s0 + $0x70] sm:$0xff]  ;;  %v85_v52 = vld [vmem:[%s1152_s0 + $0x200] sm:$0xff]  ;;  %v173_v53 = vsel %vm149_vm0, %v33_v41, 0.0  ;;  %v86_v55 = vld [vmem:[%s1152_s0 + $0x208] sm:$0xff]  ;;  %v175_v62 = vsel %vm149_vm0, %v34_v47, 0.0 }
   0x9   :  { %v223_v46 = vadd.f32 %v222_v40, %v221_v39  ;;  %v59_v51 = vld [vmem:[%s1152_s0 + $0x130] sm:$0xff]  ;;  %v88_v57 = vld [vmem:[%s1152_s0 + $0x218] sm:$0xff]  ;;  %v288_v60 = vsel %vm149_vm0, %v85_v52, 0.0  ;;  %v289_v0 = vsel %vm149_vm0, %v86_v55, 0.0  ;;  %v89_v3 = vld [vmem:[%s1152_s0 + $0x220] sm:$0xff]  ;;  %v177_v8 = vsel %vm149_vm0, %v35_v50, 0.0 }
   0xa   :  { %v158_v18 = vadd.f32 %v157_v13, %v156_v15  ;;  %v87_v56 = vld [vmem:[%s1152_s0 + $0x210] sm:$0xff]  ;;  %v60_v61 = vld [vmem:[%s1152_s0 + $0x138] sm:$0xff]  ;;  %v230_v5 = vsel %vm149_vm0, %v59_v51, 0.0  ;;  %v290_v6 = vadd.f32 %v289_v0, %v288_v60  ;;  %v61_v7 = vld [vmem:[%s1152_s0 + $0x140] sm:$0xff]  ;;  %v293_v10 = vsel %vm149_vm0, %v88_v57, 0.0 }
   0xb   :  { %v225_v54 = vadd.f32 %v224_v43, %v223_v46  ;;  %v291_v1 = vsel %vm149_vm0, %v87_v56, 0.0  ;;  %v36_v2 = vld [vmem:[%s1152_s0 + $0x78] sm:$0xff]  ;;  %v37_v11 = vld [vmem:[%s1152_s0 + $0x80] sm:$0xff]  ;;  %v90_v12 = vld [vmem:[%s1152_s0 + $0x228] sm:$0xff]  ;;  %v232_v14 = vsel %vm149_vm0, %v60_v61, 0.0 }
   0xc   :  { %v160_v21 = vadd.f32 %v159_v16, %v158_v18  ;;  %v292_v15 = vadd.f32 %v291_v1, %v290_v6  ;;  %v62_v16 = vld [vmem:[%s1152_s0 + $0x148] sm:$0xff]  ;;  %v179_v17 = vsel %vm149_vm0, %v36_v2, 0.0  ;;  %v40_v26 = vld [vmem:[%s1152_s0 + $0x98] sm:$0xff]  ;;  %v181_v28 = vsel %vm149_vm0, %v37_v11, 0.0  ;;  %v93_v40 = vld [vmem:[%s1152_s0 + $0x240] sm:$0xff] }
   0xd   :  { %v227_v63 = vadd.f32 %v226_v49, %v225_v54  ;;  %v38_v20 = vld [vmem:[%s1152_s0 + $0x88] sm:$0xff]  ;;  %v92_v31 = vld [vmem:[%s1152_s0 + $0x238] sm:$0xff]  ;;  %v236_v33 = vsel %vm149_vm0, %v62_v16, 0.0  ;;  %v117_v41 = vld [vmem:[%s1152_s0 + $0x300] sm:$0xff]  ;;  %v187_v44 = vsel %vm149_vm0, %v40_v26, 0.0 }
   0xe   :  { %v162_v24 = vadd.f32 %v161_v19, %v160_v21  ;;  %v295_v19 = vsel %vm149_vm0, %v89_v3, 0.0  ;;  %v39_v21 = vld [vmem:[%s1152_s0 + $0x90] sm:$0xff]  ;;  %v294_v25 = vadd.f32 %v293_v10, %v292_v15  ;;  %v64_v35 = vld [vmem:[%s1152_s0 + $0x158] sm:$0xff]  ;;  %v183_v36 = vsel %vm149_vm0, %v38_v20, 0.0  ;;  %v65_v47 = vld [vmem:[%s1152_s0 + $0x160] sm:$0xff] }
   0xf   :  { %v229_v9 = vadd.f32 %v228_v59, %v227_v63  ;;  %v185_v37 = vsel %vm149_vm0, %v39_v21, 0.0  ;;  %v120_v49 = vld [vmem:[%s1152_s0 + $0x318] sm:$0xff]  ;;  %v301_v51 = vsel %vm149_vm0, %v92_v31, 0.0  ;;  %v357_v52 = vsel %vm149_vm0, %v117_v41, 0.0  ;;  %v41_v54 = vld [vmem:[%s1152_s0 + $0xa0] sm:$0xff]  ;;  %v66_v55 = vld [vmem:[%s1152_s0 + $0x168] sm:$0xff] }
  0x10   :  { %v164_v30 = vadd.f32 %v163_v22, %v162_v24  ;;  %v91_v22 = vld [vmem:[%s1152_s0 + $0x230] sm:$0xff]  ;;  %v234_v24 = vsel %vm149_vm0, %v61_v7, 0.0  ;;  %v240_v57 = vsel %vm149_vm0, %v64_v35, 0.0  ;;  %v94_v60 = vld [vmem:[%s1152_s0 + $0x248] sm:$0xff]  ;;  %v362_v0 = vsel %vm149_vm0, %v120_v49, 0.0  ;;  %v121_v2 = vld [vmem:[%s1152_s0 + $0x320] sm:$0xff] }
  0x11   :  { %v231_v18 = vadd.f32 %v230_v5, %v229_v9  ;;  %v299_v39 = vsel %vm149_vm0, %v91_v22, 0.0  ;;  %v42_v1 = vld [vmem:[%s1152_s0 + $0xa8] sm:$0xff]  ;;  %v67_v7 = vld [vmem:[%s1152_s0 + $0x170] sm:$0xff]  ;;  %v244_v10 = vsel %vm149_vm0, %v66_v55, 0.0  ;;  %v68_v16 = vld [vmem:[%s1152_s0 + $0x178] sm:$0xff]  ;;  %v364_v20 = vsel %vm149_vm0, %v121_v2, 0.0 }
  0x12   :  { %v166_v34 = vadd.f32 %v165_v27, %v164_v30  ;;  %v63_v27 = vld [vmem:[%s1152_s0 + $0x150] sm:$0xff]  ;;  %v297_v30 = vsel %vm149_vm0, %v90_v12, 0.0  ;;  %v44_v21 = vld [vmem:[%s1152_s0 + $0xb8] sm:$0xff]  ;;  %v122_v22 = vld [vmem:[%s1152_s0 + $0x328] sm:$0xff] }
  0x13   :  { %v233_v29 = vadd.f32 %v232_v14, %v231_v18  ;;  %v43_v11 = vld [vmem:[%s1152_s0 + $0xb0] sm:$0xff]  ;;  %v305_v14 = vsel %vm149_vm0, %v94_v60, 0.0  ;;  %v191_v18 = vsel %vm149_vm0, %v42_v1, 0.0  ;;  %v96_v26 = vld [vmem:[%s1152_s0 + $0x258] sm:$0xff] }
  0x14   :  { %v168_v42 = vadd.f32 %v167_v32, %v166_v34  ;;  %v296_v34 = vadd.f32 %v295_v19, %v294_v25  ;;  %v69_v25 = vld [vmem:[%s1152_s0 + $0x180] sm:$0xff]  ;;  %v123_v31 = vld [vmem:[%s1152_s0 + $0x330] sm:$0xff]  ;;  %v124_v41 = vld [vmem:[%s1152_s0 + $0x338] sm:$0xff] }
  0x16   :  { %v170_v48 = vadd.f32 %v169_v38, %v168_v42  ;;  %v235_v38 = vadd.f32 %v234_v24, %v233_v29  ;;  %v118_v42 = vld [vmem:[%s1152_s0 + $0x308] sm:$0xff]  ;;  %v298_v46 = vadd.f32 %v297_v30, %v296_v34  ;;  %v246_v24 = vsel %vm149_vm0, %v67_v7, 0.0  ;;  %v45_v30 = vld [vmem:[%s1152_s0 + $0xc0] sm:$0xff] }
  0x18   :  { %v172_v58 = vadd.f32 %v171_v45, %v170_v48  ;;  %v238_v45 = vsel %vm149_vm0, %v63_v27, 0.0  ;;  %v119_v48 = vld [vmem:[%s1152_s0 + $0x310] sm:$0xff]  ;;  %v237_v50 = vadd.f32 %v236_v33, %v235_v38  ;;  %v193_v27 = vsel %vm149_vm0, %v43_v11, 0.0 }
  0x19   :  { %v360_v63 = vsel %vm149_vm0, %v119_v48, 0.0  ;;  %v248_v33 = vsel %vm149_vm0, %v68_v16, 0.0  ;;  %v195_v38 = vsel %vm149_vm0, %v44_v21, 0.0 }
  0x1a   :  { %v174_v4 = vadd.f32 %v173_v53, %v172_v58  ;;  %v358_v53 = vsel %vm149_vm0, %v118_v42, 0.0  ;;  %v300_v58 = vadd.f32 %v299_v39, %v298_v46  ;;  %v239_v61 = vadd.f32 %v238_v45, %v237_v50 }
  0x1b   :  { %v359_v59 = vadd.f32 %v358_v53, %v357_v52 }
  0x1c   :  { %v176_v13 = vadd.f32 %v175_v62, %v174_v4  ;;  %v303_v62 = vsel %vm149_vm0, %v93_v40, 0.0  ;;  %v242_v4 = vsel %vm149_vm0, %v65_v47, 0.0  ;;  %v302_v5 = vadd.f32 %v301_v51, %v300_v58 }
  0x1d   :  { %v361_v6 = vadd.f32 %v360_v63, %v359_v59  ;;  %v241_v9 = vadd.f32 %v240_v57, %v239_v61  ;;  %v366_v40 = vsel %vm149_vm0, %v122_v22, 0.0 }
  0x1e   :  { %v178_v23 = vadd.f32 %v177_v8, %v176_v13  ;;  %v189_v8 = vsel %vm149_vm0, %v41_v54, 0.0  ;;  %v304_v13 = vadd.f32 %v303_v62, %v302_v5 }
  0x1f   :  { %v363_v15 = vadd.f32 %v362_v0, %v361_v6  ;;  %v243_v19 = vadd.f32 %v242_v4, %v241_v9 }
  0x20   :  { %v180_v32 = vadd.f32 %v179_v17, %v178_v23  ;;  %v95_v17 = vld [vmem:[%s1152_s0 + $0x250] sm:$0xff]  ;;  %v306_v29 = vadd.f32 %v305_v14, %v304_v13 }
  0x21   :  { %v307_v34 = vsel %vm149_vm0, %v95_v17, 0.0  ;;  %v365_v35 = vadd.f32 %v364_v20, %v363_v15 }
  0x22   :  { %v182_v43 = vadd.f32 %v181_v28, %v180_v32  ;;  %v245_v28 = vadd.f32 %v244_v10, %v243_v19 }
  0x24   :  { %v184_v56 = vadd.f32 %v183_v36, %v182_v43  ;;  %v70_v36 = vld [vmem:[%s1152_s0 + $0x188] sm:$0xff]  ;;  %v247_v39 = vadd.f32 %v246_v24, %v245_v28  ;;  %v250_v43 = vsel %vm149_vm0, %v69_v25, 0.0 }
  0x26   :  { %v186_v3 = vadd.f32 %v185_v37, %v184_v56  ;;  %v97_v37 = vld [vmem:[%s1152_s0 + $0x260] sm:$0xff] }
  0x28   :  { %v188_v12 = vadd.f32 %v187_v44, %v186_v3  ;;  %v309_v44 = vsel %vm149_vm0, %v96_v26, 0.0 }
  0x2a   :  { %v190_v23 = vadd.f32 %v189_v8, %v188_v12 }
  0x2c   :  { %v192_v32 = vadd.f32 %v191_v18, %v190_v23 }
  0x2e   :  { %v194_v42 = vadd.f32 %v193_v27, %v192_v32 }
  0x2f   :  { %12 = vsyncpa [#allocation5], 0  ;;  %v71_v45 = vld [vmem:[%s1152_s0 + $0x190] sm:$0xff]  ;;  %v98_v46 = vld [vmem:[%s1152_s0 + $0x268] sm:$0xff]  ;;  %v197_v47 = vsel %vm149_vm0, %v45_v30, 0.0  ;;  %v249_v48 = vadd.f32 %v248_v33, %v247_v39  ;;  %v308_v49 = vadd.f32 %v307_v34, %v306_v29  ;;  %v368_v50 = vsel %vm149_vm0, %v123_v31, 0.0 }
  0x30   :  { %v46_v51 = vld [vmem:[%s1152_s0 + $0xc8] sm:$0xff]  ;;  %v125_v52 = vld [vmem:[%s1152_s0 + $0x340] sm:$0xff]  ;;  %v196_v53 = vadd.f32 %v195_v38, %v194_v42  ;;  %v252_v54 = vsel %vm149_vm0, %v70_v36, 0.0  ;;  %v311_v55 = vsel %vm149_vm0, %v97_v37, 0.0  ;;  %v367_v56 = vadd.f32 %v366_v40, %v365_v35  ;;  %v72_v57 = vld [vmem:[%s1152_s0 + $0x198] sm:$0xff]  ;;  %s592_s19 = smov [#allocation2]  }
  0x31   :  { %v99_v58 = vld [vmem:[%s1152_s0 + $0x270] sm:$0xff]  ;;  %v251_v59 = vadd.f32 %v250_v43, %v249_v48  ;;  %v310_v60 = vadd.f32 %v309_v44, %v308_v49  ;;  %v370_v61 = vsel %vm149_vm0, %v124_v41, 0.0  ;;  %v126_v62 = vld [vmem:[%s1152_s0 + $0x348] sm:$0xff]  ;;  %v254_v0 = vsel %vm149_vm0, %v71_v45, 0.0  ;;  %v73_v3 = vld [vmem:[%s1152_s0 + $0x1a0] sm:$0xff]  ;;  %s503_s20 = sshll.u32 %s592_s19, 4  ;;  %s504_s20 = int_to_ptr.vmem [resolvable:$true] %s503_s20 }
  0x32   :  { %v198_v63 = vadd.f32 %v197_v47, %v196_v53  ;;  %v313_v1 = vsel %vm149_vm0, %v98_v46, 0.0  ;;  %v369_v2 = vadd.f32 %v368_v50, %v367_v56  ;;  %v100_v4 = vld [vmem:[%s1152_s0 + $0x278] sm:$0xff]  ;;  %v199_v5 = vsel %vm149_vm0, %v46_v51, 0.0  ;;  %v47_v9 = vld [vmem:[%s1152_s0 + $0xd0] sm:$0xff]  ;;  %v74_v14 = vld [vmem:[%s1152_s0 + $0x1a8] sm:$0xff]  ;;  %s516_s27 = sshll.u32 %s1157_s5, 4  ;;  %s517_s27 = int_to_ptr.hbm [resolvable:$true] %s516_s27 }
  0x33   :  { %v253_v6 = vadd.f32 %v252_v54, %v251_v59  ;;  %v312_v7 = vadd.f32 %v311_v55, %v310_v60  ;;  %v372_v8 = vsel %vm149_vm0, %v125_v52, 0.0  ;;  %v127_v10 = vld [vmem:[%s1152_s0 + $0x350] sm:$0xff]  ;;  %v256_v11 = vsel %vm149_vm0, %v72_v57, 0.0  ;;  %v101_v15 = vld [vmem:[%s1152_s0 + $0x280] sm:$0xff]  ;;  %v128_v19 = vld [vmem:[%s1152_s0 + $0x358] sm:$0xff] }
  0x34   :  { %v315_v12 = vsel %vm149_vm0, %v99_v58, 0.0  ;;  %v371_v13 = vadd.f32 %v370_v61, %v369_v2  ;;  %v374_v18 = vsel %vm149_vm0, %v126_v62, 0.0  ;;  %v200_v20 = vadd.f32 %v199_v5, %v198_v63  ;;  %v75_v24 = vld [vmem:[%s1152_s0 + $0x1b0] sm:$0xff]  ;;  %v102_v25 = vld [vmem:[%s1152_s0 + $0x288] sm:$0xff]  ;;  %v48_v30 = vld [vmem:[%s1152_s0 + $0xd8] sm:$0xff] }
  0x35   :  { %v255_v16 = vadd.f32 %v254_v0, %v253_v6  ;;  %v314_v17 = vadd.f32 %v313_v1, %v312_v7  ;;  %v258_v21 = vsel %vm149_vm0, %v73_v3, 0.0  ;;  %v317_v22 = vsel %vm149_vm0, %v100_v4, 0.0  ;;  %v129_v31 = vld [vmem:[%s1152_s0 + $0x360] sm:$0xff]  ;;  %v76_v35 = vld [vmem:[%s1152_s0 + $0x1b8] sm:$0xff]  ;;  %v103_v36 = vld [vmem:[%s1152_s0 + $0x290] sm:$0xff] }
  0x36   :  { %v373_v23 = vadd.f32 %v372_v8, %v371_v13  ;;  %v201_v26 = vsel %vm149_vm0, %v47_v9, 0.0  ;;  %v376_v29 = vsel %vm149_vm0, %v127_v10, 0.0  ;;  %v260_v32 = vsel %vm149_vm0, %v74_v14, 0.0  ;;  %v130_v40 = vld [vmem:[%s1152_s0 + $0x368] sm:$0xff]  ;;  %v77_v45 = vld [vmem:[%s1152_s0 + $0x1c0] sm:$0xff]  ;;  %v104_v46 = vld [vmem:[%s1152_s0 + $0x298] sm:$0xff] }
  0x37   :  { %v257_v27 = vadd.f32 %v256_v11, %v255_v16  ;;  %v316_v28 = vadd.f32 %v315_v12, %v314_v17  ;;  %v319_v33 = vsel %vm149_vm0, %v101_v15, 0.0  ;;  %v378_v39 = vsel %vm149_vm0, %v128_v19, 0.0  ;;  %v49_v51 = vld [vmem:[%s1152_s0 + $0xe0] sm:$0xff]  ;;  %v131_v52 = vld [vmem:[%s1152_s0 + $0x370] sm:$0xff]  ;;  %v78_v56 = vld [vmem:[%s1152_s0 + $0x1c8] sm:$0xff] }
  0x38   :  { %v375_v34 = vadd.f32 %v374_v18, %v373_v23  ;;  %v202_v41 = vadd.f32 %v201_v26, %v200_v20  ;;  %v262_v42 = vsel %vm149_vm0, %v75_v24, 0.0  ;;  %v321_v43 = vsel %vm149_vm0, %v102_v25, 0.0  ;;  %v105_v57 = vld [vmem:[%s1152_s0 + $0x2a0] sm:$0xff]  ;;  %v132_v61 = vld [vmem:[%s1152_s0 + $0x378] sm:$0xff]  ;;  %v79_v2 = vld [vmem:[%s1152_s0 + $0x1d0] sm:$0xff] }
  0x39   :  { %v259_v37 = vadd.f32 %v258_v21, %v257_v27  ;;  %v318_v38 = vadd.f32 %v317_v22, %v316_v28  ;;  %v203_v47 = vsel %vm149_vm0, %v48_v30, 0.0  ;;  %v380_v50 = vsel %vm149_vm0, %v129_v31, 0.0  ;;  %v106_v3 = vld [vmem:[%s1152_s0 + $0x2a8] sm:$0xff]  ;;  %v133_v9 = vld [vmem:[%s1152_s0 + $0x380] sm:$0xff]  ;;  %v80_v13 = vld [vmem:[%s1152_s0 + $0x1d8] sm:$0xff] }
  0x3a   :  { %v377_v44 = vadd.f32 %v376_v29, %v375_v34  ;;  %v264_v53 = vsel %vm149_vm0, %v76_v35, 0.0  ;;  %v323_v54 = vsel %vm149_vm0, %v103_v36, 0.0  ;;  %v382_v60 = vsel %vm149_vm0, %v130_v40, 0.0  ;;  %v50_v8 = vld [vmem:[%s1152_s0 + $0xe8] sm:$0xff]  ;;  %v107_v14 = vld [vmem:[%s1152_s0 + $0x2b0] sm:$0xff]  ;;  %v81_v23 = vld [vmem:[%s1152_s0 + $0x1e0] sm:$0xff] }
  0x3b   :  { %v261_v48 = vadd.f32 %v260_v32, %v259_v37  ;;  %v320_v49 = vadd.f32 %v319_v33, %v318_v38  ;;  %v204_v62 = vadd.f32 %v203_v47, %v202_v41  ;;  %v266_v63 = vsel %vm149_vm0, %v77_v45, 0.0  ;;  %v134_v18 = vld [vmem:[%s1152_s0 + $0x388] sm:$0xff]  ;;  %v108_v24 = vld [vmem:[%s1152_s0 + $0x2b8] sm:$0xff]  ;;  %v51_v29 = vld [vmem:[%s1152_s0 + $0xf0] sm:$0xff] }
  0x3c   :  { %v379_v55 = vadd.f32 %v378_v39, %v377_v44  ;;  %v325_v0 = vsel %vm149_vm0, %v104_v46, 0.0  ;;  %v205_v4 = vsel %vm149_vm0, %v49_v51, 0.0  ;;  %v384_v7 = vsel %vm149_vm0, %v131_v52, 0.0  ;;  %v135_v30 = vld [vmem:[%s1152_s0 + $0x390] sm:$0xff]  ;;  %v82_v34 = vld [vmem:[%s1152_s0 + $0x1e8] sm:$0xff]  ;;  %v109_v35 = vld [vmem:[%s1152_s0 + $0x2c0] sm:$0xff] }
  0x3d   :  { %v263_v58 = vadd.f32 %v262_v42, %v261_v48  ;;  %v322_v59 = vadd.f32 %v321_v43, %v320_v49  ;;  %v268_v10 = vsel %vm149_vm0, %v78_v56, 0.0  ;;  %v327_v11 = vsel %vm149_vm0, %v105_v57, 0.0  ;;  %v52_v39 = vld [vmem:[%s1152_s0 + $0xf8] sm:$0xff]  ;;  %v83_v45 = vld [vmem:[%s1152_s0 + $0x1f0] sm:$0xff]  ;;  %v110_v46 = vld [vmem:[%s1152_s0 + $0x2c8] sm:$0xff] }
  0x3e   :  { %v381_v1 = vadd.f32 %v380_v50, %v379_v55  ;;  %v386_v17 = vsel %vm149_vm0, %v132_v61, 0.0  ;;  %v206_v19 = vadd.f32 %v205_v4, %v204_v62  ;;  %v270_v20 = vsel %vm149_vm0, %v79_v2, 0.0  ;;  %v136_v40 = vld [vmem:[%s1152_s0 + $0x398] sm:$0xff]  ;;  %v137_v51 = vld [vmem:[%s1152_s0 + $0x3a0] sm:$0xff]  ;;  %v111_v56 = vld [vmem:[%s1152_s0 + $0x2d0] sm:$0xff] }
  0x3f   :  { %v265_v5 = vadd.f32 %v264_v53, %v263_v58  ;;  %v324_v6 = vadd.f32 %v323_v54, %v322_v59  ;;  %v329_v21 = vsel %vm149_vm0, %v106_v3, 0.0  ;;  %v207_v25 = vsel %vm149_vm0, %v50_v8, 0.0  ;;  %v84_v55 = vld [vmem:[%s1152_s0 + $0x1f8] sm:$0xff]  ;;  %v138_v61 = vld [vmem:[%s1152_s0 + $0x3a8] sm:$0xff] }
  0x40   :  { %v383_v12 = vadd.f32 %v382_v60, %v381_v1  ;;  %v388_v28 = vsel %vm149_vm0, %v133_v9, 0.0  ;;  %v272_v31 = vsel %vm149_vm0, %v80_v13, 0.0  ;;  %v331_v32 = vsel %vm149_vm0, %v107_v14, 0.0  ;;  %v112_v2 = vld [vmem:[%s1152_s0 + $0x2d8] sm:$0xff] }
  0x41   :  { %v267_v15 = vadd.f32 %v266_v63, %v265_v5  ;;  %v326_v16 = vadd.f32 %v325_v0, %v324_v6  ;;  %v390_v38 = vsel %vm149_vm0, %v134_v18, 0.0  ;;  %v208_v41 = vadd.f32 %v207_v25, %v206_v19  ;;  %v139_v6 = vld [vmem:[%s1152_s0 + $0x3b0] sm:$0xff]  ;;  %v140_v14 = vld [vmem:[%s1152_s0 + $0x3b8] sm:$0xff]  ;;  %v114_v19 = vld [vmem:[%s1152_s0 + $0x2e8] sm:$0xff] }
  0x42   :  { %v385_v22 = vadd.f32 %v384_v7, %v383_v12  ;;  %v274_v42 = vsel %vm149_vm0, %v81_v23, 0.0  ;;  %v333_v43 = vsel %vm149_vm0, %v108_v24, 0.0  ;;  %v209_v47 = vsel %vm149_vm0, %v51_v29, 0.0  ;;  %v141_v23 = vld [vmem:[%s1152_s0 + $0x3c0] sm:$0xff]  ;;  %v142_v29 = vld [vmem:[%s1152_s0 + $0x3c8] sm:$0xff] }
  0x43   :  { %v269_v26 = vadd.f32 %v268_v10, %v267_v15  ;;  %v328_v27 = vadd.f32 %v327_v11, %v326_v16  ;;  %v392_v50 = vsel %vm149_vm0, %v135_v30, 0.0  ;;  %v276_v52 = vsel %vm149_vm0, %v82_v34, 0.0  ;;  %v113_v10 = vld [vmem:[%s1152_s0 + $0x2e0] sm:$0xff]  ;;  %v116_v34 = vld [vmem:[%s1152_s0 + $0x2f8] sm:$0xff] }
  0x44   :  { %v387_v33 = vadd.f32 %v386_v17, %v385_v22  ;;  %v335_v53 = vsel %vm149_vm0, %v109_v35, 0.0  ;;  %v211_v57 = vsel %vm149_vm0, %v52_v39, 0.0  ;;  %v394_v60 = vsel %vm149_vm0, %v136_v40, 0.0 }
  0x45   :  { %v271_v36 = vadd.f32 %v270_v20, %v269_v26  ;;  %v330_v37 = vadd.f32 %v329_v21, %v328_v27  ;;  %v210_v62 = vadd.f32 %v209_v47, %v208_v41  ;;  %v278_v63 = vsel %vm149_vm0, %v83_v45, 0.0  ;;  %v115_v26 = vld [vmem:[%s1152_s0 + $0x2f0] sm:$0xff] }
  0x46   :  { %v389_v44 = vadd.f32 %v388_v28, %v387_v33  ;;  %v337_v0 = vsel %vm149_vm0, %v110_v46, 0.0  ;;  %v396_v5 = vsel %vm149_vm0, %v137_v51, 0.0  ;;  %v280_v7 = vsel %vm149_vm0, %v84_v55, 0.0  ;;  %v145_v51 = vld [vmem:[%s1152_s0 + $0x3e0] sm:$0xff]  ;;  %v146_v55 = vld [vmem:[%s1152_s0 + $0x3e8] sm:$0xff] }
  0x47   :  { %v273_v48 = vadd.f32 %v272_v31, %v271_v36  ;;  %v332_v49 = vadd.f32 %v331_v32, %v330_v37  ;;  %v339_v8 = vsel %vm149_vm0, %v111_v56, 0.0  ;;  %v398_v13 = vsel %vm149_vm0, %v138_v61, 0.0 }
  0x48   :  { %v391_v54 = vadd.f32 %v390_v38, %v389_v44  ;;  %v212_v15 = vadd.f32 %v211_v57, %v210_v62  ;;  %v341_v16 = vsel %vm149_vm0, %v112_v2, 0.0  ;;  %v591_v18 = vmov 256.0   ;;  %v143_v38 = vld [vmem:[%s1152_s0 + $0x3d0] sm:$0xff]  ;;  %v148_v2 = vld [vmem:[%s1152_s0 + $0x3f8] sm:$0xff] }
  0x49   :  { %v275_v58 = vadd.f32 %v274_v42, %v273_v48  ;;  %v334_v59 = vadd.f32 %v333_v43, %v332_v49  ;;  %537 = vrcp.f32 %v591_v18  ;;  %v400_v22 = vsel %vm149_vm0, %v139_v6, 0.0  ;;  %v144_v43 = vld [vmem:[%s1152_s0 + $0x3d8] sm:$0xff]  ;;  %v147_v62 = vld [vmem:[%s1152_s0 + $0x3f0] sm:$0xff] }
  0x4a   :  { %v393_v1 = vadd.f32 %v392_v50, %v391_v54  ;;  %v343_v24 = vsel %vm149_vm0, %v113_v10, 0.0  ;;  %v402_v28 = vsel %vm149_vm0, %v140_v14, 0.0  ;;  %v213_v30 = vrot.slane %v212_v15, 4 }
  0x4b   :  { %v277_v3 = vadd.f32 %v276_v52, %v275_v58  ;;  %v336_v4 = vadd.f32 %v335_v53, %v334_v59  ;;  %v345_v32 = vsel %vm149_vm0, %v114_v19, 0.0  ;;  %v404_v36 = vsel %vm149_vm0, %v141_v23, 0.0 }
  0x4c   :  { %v395_v9 = vadd.f32 %v394_v60, %v393_v1  ;;  %v347_v39 = vsel %vm149_vm0, %v115_v26, 0.0  ;;  %v406_v42 = vsel %vm149_vm0, %v142_v29, 0.0  ;;  %v214_v44 = vadd.f32 %v213_v30, %v212_v15 }
  0x4d   :  { %v279_v11 = vadd.f32 %v278_v63, %v277_v3  ;;  %v338_v12 = vadd.f32 %v337_v0, %v336_v4  ;;  %v349_v46 = vsel %vm149_vm0, %v116_v34, 0.0  ;;  %v408_v49 = vsel %vm149_vm0, %v143_v38, 0.0 }
  0x4e   :  { %v397_v17 = vadd.f32 %v396_v5, %v395_v9  ;;  %v410_v54 = vsel %vm149_vm0, %v144_v43, 0.0  ;;  %v215_v56 = vrot.slane %v214_v44, 2  ;;  %v412_v60 = vsel %vm149_vm0, %v145_v51, 0.0 }
  0x4f   :  { %v281_v20 = vadd.f32 %v280_v7, %v279_v11  ;;  %v340_v21 = vadd.f32 %v339_v8, %v338_v12  ;;  %v538_v37 = vpop.eup %537  ;;  %v414_v1 = vsel %vm149_vm0, %v146_v55, 0.0  ;;  %v416_v7 = vsel %vm149_vm0, %v147_v62, 0.0 }
  0x50   :  { %v399_v25 = vadd.f32 %v398_v13, %v397_v17  ;;  %v427_v50 = vmul.f32 256.0, %v538_v37  ;;  %v216_v3 = vadd.f32 %v215_v56, %v214_v44  ;;  %v418_v11 = vsel %vm149_vm0, %v148_v2, 0.0 }
  0x51   :  { %v342_v27 = vadd.f32 %v341_v16, %v340_v21  ;;  %v282_v31 = vrot.slane %v281_v20, 4  ;;  %vm431_vm1 = vweird.f32 %v538_v37  ;;  %vm446_vm2 = vcmask 1041409  }
  0x52   :  { %v401_v33 = vadd.f32 %v400_v22, %v399_v25  ;;  %v428_v61 = vsub.f32 1.0, %v427_v50  ;;  %v217_v12 = vrot.slane %v216_v3, 1  ;;  %vm448_vm3 = vcmask 1042434  }
  0x53   :  { %v344_v35 = vadd.f32 %v343_v24, %v342_v27  ;;  %v283_v45 = vadd.f32 %v282_v31, %v281_v20  ;;  %vm450_vm4 = vcmask 1043459   ;;  %vm482_vm6 = vcmask 1043456  }
  0x54   :  { %v403_v40 = vadd.f32 %v402_v28, %v401_v33  ;;  %v429_v8 = vmul.f32 %v538_v37, %v428_v61  ;;  %v218_v18 = vadd.f32 %v217_v12, %v216_v3 }
  0x55   :  { %v346_v41 = vadd.f32 %v345_v32, %v344_v35  ;;  %v284_v57 = vrot.slane %v283_v45, 2  ;;  %v475_v35 = vlaneseq }
  0x56   :  { %v405_v47 = vadd.f32 %v404_v36, %v403_v40  ;;  %v430_v15 = vadd.f32 %v538_v37, %v429_v8  ;;  %v536_v36 = vld [vmem:[%s1155_s3] ss:$0 sm:$0xff]  ;;  %s505_s3 = sshll.u32 %s1156_s4, 4  ;;  %s506_s3 = int_to_ptr.hbm [resolvable:$true] %s505_s3 }
  0x57   :  { %v348_v48 = vadd.f32 %v347_v39, %v346_v41  ;;  %v285_v4 = vadd.f32 %v284_v57, %v283_v45  ;;  %v478_v39 = vld [vmem:[%s1153_s1] sm:$0xf]  ;;  %s593_s1 = smov [#allocation4]  }
  0x58   :  { %v407_v52 = vadd.f32 %v406_v42, %v405_v47  ;;  %v432_v21 = vsel %vm431_vm1, %v538_v37, %v430_v15  ;;  %v476_v37 = vand.u32 127, %v475_v35  ;;  %s514_s23 = sshll.u32 %s593_s1, 4  ;;  %s515_s23 = int_to_ptr.vmem [resolvable:$true] %s514_s23 }
  0x59   :  { %v350_v53 = vadd.f32 %v349_v46, %v348_v48  ;;  %v286_v13 = vrot.slane %v285_v4, 1  ;;  %v433_v25 = vmul.f32 %v432_v21, %v218_v18 }
  0x5a   :  { %v409_v58 = vadd.f32 %v408_v49, %v407_v52  ;;  %vm477_vm5 = vcmp.lt.s32.totalorder %v476_v37, 3  ;;  %vm494_vm7 = vcmp.eq.s32.totalorder %v476_v37, 0 }
  0x5b   :  { %v351_v59 = vrot.slane %v350_v53, 4  ;;  %v287_v19 = vadd.f32 %v286_v13, %v285_v4 }
  0x5c   :  { %v411_v63 = vadd.f32 %v410_v54, %v409_v58 }
  0x5d   :  { %v352_v0 = vadd.f32 %v351_v59, %v350_v53  ;;  %v434_v26 = vmul.f32 %v432_v21, %v287_v19 }
  0x5e   :  { %v413_v5 = vadd.f32 %v412_v60, %v411_v63 }
  0x5f   :  { %v353_v6 = vrot.slane %v352_v0, 2  ;;  %v447_v30 = vsel %vm446_vm2, %v434_v26, %v433_v25 }
  0x60   :  { %v415_v9 = vadd.f32 %v414_v1, %v413_v5 }
  0x61   :  { %v354_v10 = vadd.f32 %v353_v6, %v352_v0 }
  0x62   :  { %v417_v14 = vadd.f32 %v416_v7, %v415_v9 }
  0x63   :  { %v355_v17 = vrot.slane %v354_v10, 1 }
  0x64   :  { %v419_v16 = vadd.f32 %v418_v11, %v417_v14 }
  0x65   :  { %v356_v23 = vadd.f32 %v355_v17, %v354_v10 }
  0x66   :  { %v420_v20 = vrot.slane %v419_v16, 4 }
  0x67   :  { %v435_v28 = vmul.f32 %v432_v21, %v356_v23 }
  0x68   :  { %v421_v22 = vadd.f32 %v420_v20, %v419_v16 }
  0x69   :  { %v449_v32 = vsel %vm448_vm3, %v435_v28, %v447_v30 }
  0x6a   :  { %v422_v24 = vrot.slane %v421_v22, 2 }
  0x6c   :  { %v423_v27 = vadd.f32 %v422_v24, %v421_v22 }
  0x6e   :  { %v424_v29 = vrot.slane %v423_v27, 1 }
  0x70   :  { %v425_v31 = vadd.f32 %v424_v29, %v423_v27 }
  0x72   :  { %v436_v33 = vmul.f32 %v432_v21, %v425_v31 }
  0x74   :  { %v451_v34 = vsel %vm450_vm4, %v436_v33, %v449_v32 }
  0x75   :  { %530 = vmatmul.msk.f32.vlgmr.msra.gmra.mxu0 %vm149_vm0, %v451_v34 }
  0xf2   :  { %v471_v38 = vpop.f32.mrf.mxu0 }
  0xf3   :  { %v472_v40 = vadd.f32 %v536_v36, %v471_v38 }
  0xf5   :  { %v479_v41 = vadd.f32 %v478_v39, %v472_v40  ;;  %474 = vst [vmem:[#allocation2] sm:$0xf] %v472_v40 }
  0xf6   :  { %508 = dma.vmem_to_hbm [thread:$0]  %s504_s20, 64, %s506_s3, [#allocation3]  }
  0xf7   :  { %v480_v42 = vsel %vm477_vm5, %v479_v41, 0.0 }
  0xf8   :  { %v481_v43 = vmul.f32 %v480_v42, %v480_v42 }
  0xfa   :  { %v483_v44 = vsel %vm482_vm6, %v481_v43, 0.0 }
  0xfb   :  { %484 = vadd.xlane.f32.xlu0 %v483_v44 }
 0x16e   :  { %v485_v45 = vpop.xlane.xlu0 %484 }
 0x16f   :  { %v486_v46 = vrot.slane %v485_v45, 4 }
 0x171   :  { %v487_v47 = vadd.f32 %v486_v46, %v485_v45 }
 0x173   :  { %v488_v48 = vrot.slane %v487_v47, 2 }
 0x175   :  { %v489_v49 = vadd.f32 %v488_v48, %v487_v47 }
 0x177   :  { %v490_v50 = vrot.slane %v489_v49, 1 }
 0x179   :  { %v491_v51 = vadd.f32 %v490_v50, %v489_v49 }
 0x17b   :  { %531 = vpush %v491_v51 }
 0x1ac   :  { %s532_s24 = spop %531 }
 0x1ad   :  { %s493_s2 = smul.f32 0.083333336, %s532_s24 }
 0x1af   :  { %v495_v52 = vstv %s493_s2 }
 0x1b0   :  { %v496_v53 = vsel %vm494_vm7, %v495_v52, 0.0 }
 0x1b1   :  { %497 = vst [vmem:[#allocation4] sm:$0x1] %v496_v53 }
 0x1b2   :  { %519 = dma.vmem_to_hbm [thread:$0]  %s515_s23, 16, %s517_s27, [#allocation5]  }
 0x1b3   :  { %587 = dma.done.wait [#allocation3], 64  }
 0x1b4   :  { %588 = vsyncadd [#allocation3], 4294967232 }
 0x1b5   :  { %589 = dma.done.wait [#allocation5], 16  }
 0x1b6   :  { %590 = vsyncadd [#allocation5], 4294967280 }
 0x1b7   :  { %528 = vsyncpa [#allocation3], 1 }
 0x1b8   :  { %529 = vsyncpa [#allocation5], 1 }

</bundles_post_ra>
